<compile_context>
chip_gen: v7x
topology: tpu7x:2x2x1
jax: 0.10.0
libtpu: 0.0.40
codegen_flags: <defaults>
</compile_context>

<pallas_src>
import math
import jax
import jax.numpy as jnp
from jax.experimental import pallas as pl
from jax.experimental.pallas import tpu as pltpu

LANES = 128  # TPU lane width; all feature dims zero-padded to this.


# ----------------------------------------------------------------------------
# Fused forward kernel (one invocation does the whole HNNF forward)
# ----------------------------------------------------------------------------
def _make_hnnf_kernel(n_levels: int, batch: int):
    L1 = n_levels + 1  # torch's `level_number`

    def kernel(xs_ref, w_ref, aux_ref, o_ref):
        # --- Level chain -----------------------------------------------------
        # `blocks` mirrors torch's growing `outputs` (row blocks of B rows each),
        # kept register-resident: each (B,128) f32 block is exactly one vreg.
        # Static python loops -> fully unrolled, all indices compile-time constants.
        blocks = [xs_ref[0]]
        for i in range(n_levels):
            w = w_ref[i]                       # (128,128) block-diagonal level weight
            b = aux_ref[pl.ds(i, 1), :]        # (1,128) level bias (zero-padded)
            blocks = [
                jnp.maximum(
                    jnp.dot(blk, w, preferred_element_type=jnp.float32) + b, 0.0
                )
                for blk in blocks
            ]
            blocks.append(xs_ref[i + 1])       # torch.cat([outputs, x[i+1]], dim=0)

        # --- Folded final head -------------------------------------------------
        # Torch: h = row-regather of the L1 blocks (each 1 valid column), then
        # abs(fc_final2(fc_final1(h))).  Folded: out = |h @ (W1@W2) + (b1@W2+b2)|.
        # h[:, k] == column 0 of block k; every block is exactly zero outside
        # lane 0 (zero-padded weights/bias + ReLU, zero-padded inputs), so
        # column 0 == lane-sum -> a clean XLU reduction, then VPU FMAs only.
        acc = jnp.zeros((batch, LANES), jnp.float32)
        for k in range(L1):
            col0 = jnp.sum(blocks[k], axis=-1, keepdims=True)     # (B,1)
            w12k = aux_ref[pl.ds(n_levels + k, 1), :]             # (1,128) folded row
            acc = acc + col0 * w12k
        b12 = aux_ref[pl.ds(n_levels + L1, 1), :]                 # (1,128) folded bias
        o_ref[...] = jnp.abs(acc + b12)

    return kernel


def hnnf_forward(xs_packed, packed, nodes):
    """Single fused pallas_call implementing HNNF.forward.

    xs_packed: (L1, B, 128) f32 from pack_hnnf_inputs (pre-packed outside hot path).
    packed:    (Wlev, aux) from pack_hnnf_params.
    """
    Wlev, aux = packed
    n_levels = len(nodes)
    B = xs_packed.shape[1]
    W0 = sum(nodes[0])

    vmem = pltpu.MemorySpace.VMEM
    out = pl.pallas_call(
        _make_hnnf_kernel(n_levels, B),
        out_shape=jax.ShapeDtypeStruct((B, LANES), jnp.float32),
        # No grid: single invocation, full arrays resident in VMEM, no double-buffering.
        in_specs=[
            pl.BlockSpec(memory_space=vmem),   # xs_packed (L1, B, 128)
            pl.BlockSpec(memory_space=vmem),   # level weights (n_levels, 128, 128)
            pl.BlockSpec(memory_space=vmem),   # aux: biases + folded head (8, 128)
        ],
        out_specs=pl.BlockSpec(memory_space=vmem),
    )(xs_packed, Wlev, aux)
    # Padded lanes of the output are exactly zero; slice back to the true width.
    return out[:, :W0]


# ----------------------------------------------------------------------------
# Parameter construction (mimics nn.Linear's U(-1/sqrt(in), +) init) + packing
# ----------------------------------------------------------------------------
def _pad2d(a, rows, cols):
    r, c = a.shape
    return jnp.zeros((rows, cols), a.dtype).at[:r, :c].set(a)


def _linear_params(key, fan_in, fan_out):
    kw, kb = jax.random.split(key)
    bound = 1.0 / math.sqrt(fan_in)
    w = jax.random.uniform(kw, (fan_in, fan_out), jnp.float32, -bound, bound)
    b = jax.random.uniform(kb, (1, fan_out), jnp.float32, -bound, bound)
    return w, b


def init_hnnf_params(key, nodes):
    """Per-node Linear(node,1) layers packed into block-diagonal level matrices."""
    level_Ws, level_bs = [], []
    for level in nodes:
        n_in, n_out = sum(level), len(level)
        W = jnp.zeros((n_in, n_out), jnp.float32)
        b_cols = []
        start = 0
        for j, sz in enumerate(level):
            key, kw, kb = jax.random.split(key, 3)
            bound = 1.0 / math.sqrt(sz)
            w_j = jax.random.uniform(kw, (sz,), jnp.float32, -bound, bound)
            W = W.at[start:start + sz, j].set(w_j)
            b_cols.append(jax.random.uniform(kb, (), jnp.float32, -bound, bound))
            start += sz
        level_Ws.append(W)
        level_bs.append(jnp.stack(b_cols).reshape(1, n_out))
    key, k1, k2 = jax.random.split(key, 3)
    W1, b1 = _linear_params(k1, len(nodes) + 1, sum(nodes[0]))   # fc_final1
    W2, b2 = _linear_params(k2, sum(nodes[0]), sum(nodes[0]))    # fc_final2
    return level_Ws, level_bs, (W1, b1), (W2, b2)


def pack_hnnf_params(params, nodes):
    """Zero-pad / stack / FOLD params into the lane-dense layout the kernel expects.

    Returns:
      Wlev: (n_levels, 128, 128)  block-diagonal per-level weights.
      aux:  (n_levels + L1 + 1, 128) rows = [level biases | W1@W2 rows | b1@W2+b2].
    """
    level_Ws, level_bs, (W1, b1), (W2, b2) = params
    n_levels = len(nodes)
    L1 = n_levels + 1
    w_last = len(nodes[-1])
    # Torch's fc_final1 only makes sense when the last level has a single node.
    assert w_last == 1 and W1.shape[0] == L1, \
        "fc_final1 in_features must equal level_number (len(nodes[-1]) must be 1)"

    Wlev = jnp.stack([_pad2d(W, LANES, LANES) for W in level_Ws])      # (n_levels,128,128)
    bias_rows = jnp.concatenate([_pad2d(b, 1, LANES) for b in level_bs], axis=0)

    # Fold fc_final1 @ fc_final2 at pack time (no nonlinearity between them).
    W12 = W1 @ W2                      # (L1, W0)
    b12 = b1 @ W2 + b2                 # (1, W0)
    aux = jnp.concatenate(
        [bias_rows, _pad2d(W12, L1, LANES), _pad2d(b12, 1, LANES)], axis=0
    )                                  # (n_levels + L1 + 1, 128)
    return Wlev, aux


def pack_hnnf_inputs(xs):
    """Zero-pad each x[i] to 128 lanes and stack -> (L1, B, 128).

    Done once per input batch, outside the kernel hot path (perf-review item 6).
    Exact zero padding is required: the kernel's col-0 lane-sum and the inert
    block-diagonal matmul padding both rely on it.
    """
    B = xs[0].shape[0]
    return jnp.stack([_pad2d(x, B, LANES) for x in xs])


# ----------------------------------------------------------------------------
# Pure-JAX reference (mirrors HNNF.forward, unfolded) for correctness check
# ----------------------------------------------------------------------------
def hnnf_reference(xs, params):
    level_Ws, level_bs, (W1, b1), (W2, b2) = params
    outputs = xs[0]
    batch_size = xs[0].shape[0]
    n_levels = len(level_Ws)
    for i in range(n_levels):
        level_out = jnp.maximum(outputs @ level_Ws[i] + level_bs[i], 0.0)
        outputs = jnp.concatenate([level_out, xs[i + 1]], axis=0)
    chunks = [outputs[k * batch_size:(k + 1) * batch_size] for k in range(n_levels + 1)]
    h = jnp.concatenate(chunks, axis=1)
    return jnp.abs((h @ W1 + b1) @ W2 + b2)


if __name__ == "__main__":
    # HNNF topology: last level has a single node so the final row-regather width
    # equals len(nodes)+1 == fc_final1.in_features (as the torch code implies).
    nodes = [[4, 4, 4, 4], [2, 2], [2]]
    batch = 8   # multiple of 8 -> all row blocks are sublane-aligned (one vreg each)

    key = jax.random.PRNGKey(0)
    k_par, k0, k1, k2, k3 = jax.random.split(key, 5)
    params = init_hnnf_params(k_par, nodes)
    packed = pack_hnnf_params(params, nodes)

    # x is a list: x[0] (B, sum(nodes[0])); x[i+1] has len(nodes[i]) columns, B rows.
    xs = [
        jax.random.normal(k0, (batch, sum(nodes[0])), jnp.float32),   # (8, 16)
        jax.random.normal(k1, (batch, len(nodes[0])), jnp.float32),   # (8, 4)
        jax.random.normal(k2, (batch, len(nodes[1])), jnp.float32),   # (8, 2)
        jax.random.normal(k3, (batch, len(nodes[2])), jnp.float32),   # (8, 1)
    ]

    # One-time input packing outside the kernel hot path.
    xs_packed = jax.block_until_ready(pack_hnnf_inputs(xs))

    out = jax.block_until_ready(hnnf_forward(xs_packed, packed, nodes))

    ref = hnnf_reference(xs, params)
    assert out.shape == (batch, sum(nodes[0]))
    assert jnp.allclose(out, ref, atol=1e-4, rtol=1e-4)
    print("KERNEL_OK")
</pallas_src>

<mosaic_0001>
module attributes {stable_mosaic.version = 11 : i64} {
  func.func @kernel(%arg0: memref<4x8x128xf32, #tpu.memory_space<vmem>>, %arg1: memref<3x128x128xf32, #tpu.memory_space<vmem>>, %arg2: memref<8x128xf32, #tpu.memory_space<vmem>>, %arg3: memref<8x128xf32, #tpu.memory_space<vmem>>) attributes {dimension_semantics = [], scalar_prefetch = 0 : i64, scratch_operands = 0 : i64, tpu.core_type = #tpu.core_type<tc>} {
    %c0 = arith.constant 0 : index
    %c0_0 = arith.constant 0 : index
    %c0_1 = arith.constant 0 : index
    %0 = vector.load %arg0[%c0, %c0_0, %c0_1] : memref<4x8x128xf32, #tpu.memory_space<vmem>>, vector<1x8x128xf32>
    %1 = vector.shape_cast %0 : vector<1x8x128xf32> to vector<8x128xf32>
    %c0_2 = arith.constant 0 : index
    %c0_3 = arith.constant 0 : index
    %c0_4 = arith.constant 0 : index
    %2 = vector.load %arg1[%c0_2, %c0_3, %c0_4] : memref<3x128x128xf32, #tpu.memory_space<vmem>>, vector<1x128x128xf32>
    %3 = vector.shape_cast %2 : vector<1x128x128xf32> to vector<128x128xf32>
    %c0_5 = arith.constant 0 : index
    %c0_6 = arith.constant 0 : index
    %4 = vector.load %arg2[%c0_5, %c0_6] : memref<8x128xf32, #tpu.memory_space<vmem>>, vector<1x128xf32>
    %cst = arith.constant dense<0.000000e+00> : vector<8x128xf32>
    %5 = tpu.matmul %1, %3, %cst {dimension_numbers = #tpu.dot_dimension_numbers<[1], [0], [0], [1], [0, 0, 1, 1], [], []>} : vector<8x128xf32>, vector<128x128xf32>, vector<8x128xf32> -> vector<8x128xf32>
    %6 = vector.broadcast %4 : vector<1x128xf32> to vector<8x128xf32>
    %7 = arith.addf %5, %6 : vector<8x128xf32>
    %cst_7 = arith.constant 0.000000e+00 : f32
    %8 = vector.broadcast %cst_7 : f32 to vector<8x128xf32>
    %9 = arith.maximumf %7, %8 : vector<8x128xf32>
    %c1 = arith.constant 1 : index
    %c0_8 = arith.constant 0 : index
    %c0_9 = arith.constant 0 : index
    %10 = vector.load %arg0[%c1, %c0_8, %c0_9] : memref<4x8x128xf32, #tpu.memory_space<vmem>>, vector<1x8x128xf32>
    %11 = vector.shape_cast %10 : vector<1x8x128xf32> to vector<8x128xf32>
    %c1_10 = arith.constant 1 : index
    %c0_11 = arith.constant 0 : index
    %c0_12 = arith.constant 0 : index
    %12 = vector.load %arg1[%c1_10, %c0_11, %c0_12] : memref<3x128x128xf32, #tpu.memory_space<vmem>>, vector<1x128x128xf32>
    %13 = vector.shape_cast %12 : vector<1x128x128xf32> to vector<128x128xf32>
    %c1_13 = arith.constant 1 : index
    %c0_14 = arith.constant 0 : index
    %14 = vector.load %arg2[%c1_13, %c0_14] : memref<8x128xf32, #tpu.memory_space<vmem>>, vector<1x128xf32>
    %cst_15 = arith.constant dense<0.000000e+00> : vector<8x128xf32>
    %15 = tpu.matmul %9, %13, %cst_15 {dimension_numbers = #tpu.dot_dimension_numbers<[1], [0], [0], [1], [0, 0, 1, 1], [], []>} : vector<8x128xf32>, vector<128x128xf32>, vector<8x128xf32> -> vector<8x128xf32>
    %16 = vector.broadcast %14 : vector<1x128xf32> to vector<8x128xf32>
    %17 = arith.addf %15, %16 : vector<8x128xf32>
    %cst_16 = arith.constant 0.000000e+00 : f32
    %18 = vector.broadcast %cst_16 : f32 to vector<8x128xf32>
    %19 = arith.maximumf %17, %18 : vector<8x128xf32>
    %cst_17 = arith.constant dense<0.000000e+00> : vector<8x128xf32>
    %20 = tpu.matmul %11, %13, %cst_17 {dimension_numbers = #tpu.dot_dimension_numbers<[1], [0], [0], [1], [0, 0, 1, 1], [], []>} : vector<8x128xf32>, vector<128x128xf32>, vector<8x128xf32> -> vector<8x128xf32>
    %21 = vector.broadcast %14 : vector<1x128xf32> to vector<8x128xf32>
    %22 = arith.addf %20, %21 : vector<8x128xf32>
    %cst_18 = arith.constant 0.000000e+00 : f32
    %23 = vector.broadcast %cst_18 : f32 to vector<8x128xf32>
    %24 = arith.maximumf %22, %23 : vector<8x128xf32>
    %c2 = arith.constant 2 : index
    %c0_19 = arith.constant 0 : index
    %c0_20 = arith.constant 0 : index
    %25 = vector.load %arg0[%c2, %c0_19, %c0_20] : memref<4x8x128xf32, #tpu.memory_space<vmem>>, vector<1x8x128xf32>
    %26 = vector.shape_cast %25 : vector<1x8x128xf32> to vector<8x128xf32>
    %c2_21 = arith.constant 2 : index
    %c0_22 = arith.constant 0 : index
    %c0_23 = arith.constant 0 : index
    %27 = vector.load %arg1[%c2_21, %c0_22, %c0_23] : memref<3x128x128xf32, #tpu.memory_space<vmem>>, vector<1x128x128xf32>
    %28 = vector.shape_cast %27 : vector<1x128x128xf32> to vector<128x128xf32>
    %c2_24 = arith.constant 2 : index
    %c0_25 = arith.constant 0 : index
    %29 = vector.load %arg2[%c2_24, %c0_25] : memref<8x128xf32, #tpu.memory_space<vmem>>, vector<1x128xf32>
    %cst_26 = arith.constant dense<0.000000e+00> : vector<8x128xf32>
    %30 = tpu.matmul %19, %28, %cst_26 {dimension_numbers = #tpu.dot_dimension_numbers<[1], [0], [0], [1], [0, 0, 1, 1], [], []>} : vector<8x128xf32>, vector<128x128xf32>, vector<8x128xf32> -> vector<8x128xf32>
    %31 = vector.broadcast %29 : vector<1x128xf32> to vector<8x128xf32>
    %32 = arith.addf %30, %31 : vector<8x128xf32>
    %cst_27 = arith.constant 0.000000e+00 : f32
    %33 = vector.broadcast %cst_27 : f32 to vector<8x128xf32>
    %34 = arith.maximumf %32, %33 : vector<8x128xf32>
    %cst_28 = arith.constant dense<0.000000e+00> : vector<8x128xf32>
    %35 = tpu.matmul %24, %28, %cst_28 {dimension_numbers = #tpu.dot_dimension_numbers<[1], [0], [0], [1], [0, 0, 1, 1], [], []>} : vector<8x128xf32>, vector<128x128xf32>, vector<8x128xf32> -> vector<8x128xf32>
    %36 = vector.broadcast %29 : vector<1x128xf32> to vector<8x128xf32>
    %37 = arith.addf %35, %36 : vector<8x128xf32>
    %cst_29 = arith.constant 0.000000e+00 : f32
    %38 = vector.broadcast %cst_29 : f32 to vector<8x128xf32>
    %39 = arith.maximumf %37, %38 : vector<8x128xf32>
    %cst_30 = arith.constant dense<0.000000e+00> : vector<8x128xf32>
    %40 = tpu.matmul %26, %28, %cst_30 {dimension_numbers = #tpu.dot_dimension_numbers<[1], [0], [0], [1], [0, 0, 1, 1], [], []>} : vector<8x128xf32>, vector<128x128xf32>, vector<8x128xf32> -> vector<8x128xf32>
    %41 = vector.broadcast %29 : vector<1x128xf32> to vector<8x128xf32>
    %42 = arith.addf %40, %41 : vector<8x128xf32>
    %cst_31 = arith.constant 0.000000e+00 : f32
    %43 = vector.broadcast %cst_31 : f32 to vector<8x128xf32>
    %44 = arith.maximumf %42, %43 : vector<8x128xf32>
    %c3 = arith.constant 3 : index
    %c0_32 = arith.constant 0 : index
    %c0_33 = arith.constant 0 : index
    %45 = vector.load %arg0[%c3, %c0_32, %c0_33] : memref<4x8x128xf32, #tpu.memory_space<vmem>>, vector<1x8x128xf32>
    %46 = vector.shape_cast %45 : vector<1x8x128xf32> to vector<8x128xf32>
    %cst_34 = arith.constant 0.000000e+00 : f32
    %47 = vector.broadcast %cst_34 : f32 to vector<8x128xf32>
    %cst_35 = arith.constant dense<0.000000e+00> : vector<8xf32>
    %48 = vector.multi_reduction <add>, %34, %cst_35 [1] : vector<8x128xf32> to vector<8xf32>
    %49 = vector.shape_cast %48 : vector<8xf32> to vector<8x1xf32>
    %c3_36 = arith.constant 3 : index
    %c0_37 = arith.constant 0 : index
    %50 = vector.load %arg2[%c3_36, %c0_37] : memref<8x128xf32, #tpu.memory_space<vmem>>, vector<1x128xf32>
    %51 = vector.broadcast %49 : vector<8x1xf32> to vector<8x128xf32>
    %52 = vector.broadcast %50 : vector<1x128xf32> to vector<8x128xf32>
    %53 = arith.mulf %51, %52 : vector<8x128xf32>
    %54 = arith.addf %47, %53 : vector<8x128xf32>
    %cst_38 = arith.constant dense<0.000000e+00> : vector<8xf32>
    %55 = vector.multi_reduction <add>, %39, %cst_38 [1] : vector<8x128xf32> to vector<8xf32>
    %56 = vector.shape_cast %55 : vector<8xf32> to vector<8x1xf32>
    %c4 = arith.constant 4 : index
    %c0_39 = arith.constant 0 : index
    %57 = vector.load %arg2[%c4, %c0_39] : memref<8x128xf32, #tpu.memory_space<vmem>>, vector<1x128xf32>
    %58 = vector.broadcast %56 : vector<8x1xf32> to vector<8x128xf32>
    %59 = vector.broadcast %57 : vector<1x128xf32> to vector<8x128xf32>
    %60 = arith.mulf %58, %59 : vector<8x128xf32>
    %61 = arith.addf %54, %60 : vector<8x128xf32>
    %cst_40 = arith.constant dense<0.000000e+00> : vector<8xf32>
    %62 = vector.multi_reduction <add>, %44, %cst_40 [1] : vector<8x128xf32> to vector<8xf32>
    %63 = vector.shape_cast %62 : vector<8xf32> to vector<8x1xf32>
    %c5 = arith.constant 5 : index
    %c0_41 = arith.constant 0 : index
    %64 = vector.load %arg2[%c5, %c0_41] : memref<8x128xf32, #tpu.memory_space<vmem>>, vector<1x128xf32>
    %65 = vector.broadcast %63 : vector<8x1xf32> to vector<8x128xf32>
    %66 = vector.broadcast %64 : vector<1x128xf32> to vector<8x128xf32>
    %67 = arith.mulf %65, %66 : vector<8x128xf32>
    %68 = arith.addf %61, %67 : vector<8x128xf32>
    %cst_42 = arith.constant dense<0.000000e+00> : vector<8xf32>
    %69 = vector.multi_reduction <add>, %46, %cst_42 [1] : vector<8x128xf32> to vector<8xf32>
    %70 = vector.shape_cast %69 : vector<8xf32> to vector<8x1xf32>
    %c6 = arith.constant 6 : index
    %c0_43 = arith.constant 0 : index
    %71 = vector.load %arg2[%c6, %c0_43] : memref<8x128xf32, #tpu.memory_space<vmem>>, vector<1x128xf32>
    %72 = vector.broadcast %70 : vector<8x1xf32> to vector<8x128xf32>
    %73 = vector.broadcast %71 : vector<1x128xf32> to vector<8x128xf32>
    %74 = arith.mulf %72, %73 : vector<8x128xf32>
    %75 = arith.addf %68, %74 : vector<8x128xf32>
    %c7 = arith.constant 7 : index
    %c0_44 = arith.constant 0 : index
    %76 = vector.load %arg2[%c7, %c0_44] : memref<8x128xf32, #tpu.memory_space<vmem>>, vector<1x128xf32>
    %77 = vector.broadcast %76 : vector<1x128xf32> to vector<8x128xf32>
    %78 = arith.addf %75, %77 : vector<8x128xf32>
    %79 = math.absf %78 : vector<8x128xf32>
    %c0_45 = arith.constant 0 : index
    %c0_46 = arith.constant 0 : index
    %80 = vector.load %arg3[%c0_45, %c0_46] : memref<8x128xf32, #tpu.memory_space<vmem>>, vector<8x128xf32>
    tpu.vector_store %arg3[%c0_45, %c0_46], %79 {strides = array<i32>} : memref<8x128xf32, #tpu.memory_space<vmem>>, vector<8x128xf32>,
    return
  }
}

</mosaic_0001>

<bundles_post_ra>
// kernel: tpu_custom_call.1
= control target key start
LH: loop header
LB: loop body
LE: loop exit
PB: predicated region body
PF: predicated region fallthrough
CT: control target
= control target key end

     0   :  { %8 = vsyncpa [#allocation3], 0  ;;  %s1338_s0 = inlined_call_operand.hbm [shape: f32[4,8,128], index: 0, kind: input, shape index: {}]   ;;  %s1339_s1 = inlined_call_operand.hbm [shape: f32[3,128,128], index: 1, kind: input, shape index: {}]   ;;  %s1340_s2 = inlined_call_operand.hbm [shape: f32[8,128], index: 2, kind: input, shape index: {}]   ;;  %s1341_s3 = inlined_call_operand.hbm [shape: f32[8,128], index: 3, kind: output, shape index: {}]  }
   0x1   :  { %9 = vsyncpa [#allocation6], 0 }
   0x2   :  { %10 = vsyncpa [#allocation4], 0  ;;  %s1179_s12 = smov [#allocation5]   ;;  %s1180_s14 = smov [#allocation2]  }
   0x3   :  { %s28_s13 = sshll.u32 %s1179_s12, 4  ;;  %s16_s15 = sshll.u32 %s1180_s14, 4  ;;  %s29_s13 = int_to_ptr.vmem [resolvable:$true] %s28_s13  ;;  %s1208_s15 = int_to_ptr.vmem [resolvable:$true] %s16_s15 }
   0x4   :  { %s1085_s18 = scalar_lea.hbm %s1339_s1, 6144 }
   0x5   :  { %p1086_p0 = scmp.ne.s32.totalorder %s1339_s1, %s1085_s18  ;;  %p1089_p1 = scmp.lt.u32.totalorder %s1085_s18, %s1339_s1 }
   0x7   :  { %p1091_p2 = pnand %p1089_p1, %p1086_p0 }
   0x9   :  { %1094 = shalt.err (!%p1091_p2)
}
   0xa   :  { %s1095_s23 = scalar_lea.vmem %s29_s13, 6144  ;;  %p1100_p4 = scmp.lt.s32.totalorder %s29_s13, %s29_s13 }
   0xb   :  { %p1096_p3 = scmp.ne.s32.totalorder %s29_s13, %s1095_s23  ;;  %p1101_p5 = scmp.lt.s32.totalorder %s1095_s23, %s1095_s23 }
   0xd   :  { %p1102_p6 = por %p1101_p5, %p1100_p4 }
   0xf   :  { %p1103_p7 = pnand %p1102_p6, %p1096_p3 }
  0x11   :  { %1106 = shalt.err (!%p1103_p7)
}
  0x12   :  { %s1181_s24 = smov 128   ;;  %s1182_s25 = smov 8  }
  0x13   :  { %34 = dma.hbm_to_vmem [thread:$0]  %s1339_s1, 6144, %s29_s13, [#allocation6], %s1181_s24, %s1181_s24, %s1182_s25  }
  0x14   :  { %s1107_s30 = scalar_lea.hbm %s1338_s0, 512 }
  0x15   :  { %p1108_p8 = scmp.ne.s32.totalorder %s1338_s0, %s1107_s30  ;;  %p1111_p9 = scmp.lt.u32.totalorder %s1107_s30, %s1338_s0 }
  0x17   :  { %p1113_p10 = pnand %p1111_p9, %p1108_p8 }
  0x19   :  { %1116 = shalt.err (!%p1113_p10)
}
  0x1a   :  { %s1117_s8 = scalar_lea.vmem %s1208_s15, 512  ;;  %p1122_p12 = scmp.lt.s32.totalorder %s1208_s15, %s1208_s15 }
  0x1b   :  { %p1118_p11 = scmp.ne.s32.totalorder %s1208_s15, %s1117_s8  ;;  %p1123_p13 = scmp.lt.s32.totalorder %s1117_s8, %s1117_s8 }
  0x1d   :  { %p1124_p0 = por %p1123_p13, %p1122_p12 }
  0x1f   :  { %p1125_p1 = pnand %p1124_p0, %p1118_p11 }
  0x21   :  { %1128 = shalt.err (!%p1125_p1)
}
  0x22   :  { %22 = dma.hbm_to_vmem [thread:$0]  %s1338_s0, 512, %s1208_s15, [#allocation3], %s1181_s24, %s1181_s24, %s1182_s25  }
  0x23   :  { %s1183_s10 = smov [#allocation7]   ;;  %s1129_s14 = scalar_lea.hbm %s1340_s2, 128 }
  0x24   :  { %s41_s11 = sshll.u32 %s1183_s10, 4  ;;  %p1130_p2 = scmp.ne.s32.totalorder %s1340_s2, %s1129_s14  ;;  %s42_s11 = int_to_ptr.vmem [resolvable:$true] %s41_s11 }
  0x25   :  { %p1133_p3 = scmp.lt.u32.totalorder %s1129_s14, %s1340_s2 }
  0x27   :  { %p1135_p4 = pnand %p1133_p3, %p1130_p2 }
  0x29   :  { %1138 = shalt.err (!%p1135_p4)
}
  0x2a   :  { %s1139_s20 = scalar_lea.vmem %s42_s11, 128  ;;  %p1144_p6 = scmp.lt.s32.totalorder %s42_s11, %s42_s11 }
  0x2b   :  { %p1140_p5 = scmp.ne.s32.totalorder %s42_s11, %s1139_s20  ;;  %p1145_p7 = scmp.lt.s32.totalorder %s1139_s20, %s1139_s20 }
  0x2d   :  { %p1146_p8 = por %p1145_p7, %p1144_p6 }
  0x2f   :  { %p1147_p9 = pnand %p1146_p8, %p1140_p5 }
  0x31   :  { %1150 = shalt.err (!%p1147_p9)
}
  0x32   :  { %44 = dma.hbm_to_vmem [thread:$0]  %s1340_s2, 128, %s42_s11, [#allocation6]  }
  0x33   :  { %1173 = dma.done.wait [#allocation3], 512  }
  0x34   :  { %1174 = vsyncadd [#allocation3], 4294966784 }
  0x35   :  { %1175 = dma.done.wait [#allocation6], 6272  }
  0x36   :  { %1176 = vsyncadd [#allocation6], 4294961024  ;;  %v1184_v0 = vmov 0.0|0.0   ;;  %vm1185_vm0 = vmmov 0   ;;  %v1186_v1 = vmov 0.0   ;;  %v55_v2 = vld [vmem:[#allocation5] sm:$0xff] }
  0x37   :  { %932 = vmatprep.subr.bf16.mxu0 %v1184_v0  ;;  %754 = vmatprep.mubr.msk.f32.mxu0 %vm1185_vm0, %v1186_v1  ;;  %v56_v3 = vld [vmem:[#allocation5 + $0x8] sm:$0xff]  ;;  %v57_v4 = vld [vmem:[#allocation5 + $0x10] sm:$0xff]  ;;  %v58_v6 = vld [vmem:[#allocation5 + $0x18] sm:$0xff]  ;;  %s1187_s2 = smov [#allocation8]  }
  0x38   :  { %956 = vmatprep.subr.bf16.mxu1 %v1184_v0  ;;  %789 = vmatprep.mubr.msk.f32.mxu1 %vm1185_vm0, %v1186_v1  ;;  %v933_v5 = vpack.c.bf16 %v56_v3, %v55_v2  ;;  %v936_v7 = vpack.c.bf16 %v58_v6, %v57_v4  ;;  %v59_v8 = vld [vmem:[#allocation5 + $0x20] sm:$0xff]  ;;  %v60_v9 = vld [vmem:[#allocation5 + $0x28] sm:$0xff]  ;;  %v152_v12 = vld [vmem:[#allocation5 + $0x90] sm:$0xff]  ;;  %s602_s21 = sshll.u32 %s1187_s2, 4  ;;  %s603_s21 = int_to_ptr.vmem [resolvable:$true] %s602_s21 }
  0x39   :  { %v150_v10 = vld [vmem:[#allocation5 + $0x80] sm:$0xff]  ;;  %v151_v11 = vld [vmem:[#allocation5 + $0x88] sm:$0xff]  ;;  %v153_v13 = vld [vmem:[#allocation5 + $0x98] sm:$0xff]  ;;  %v939_v14 = vpack.c.bf16 %v60_v9, %v59_v8  ;;  %s1151_s22 = scalar_lea.vmem %s603_s21, 128  ;;  %p1156_p11 = scmp.lt.s32.totalorder %s603_s21, %s603_s21 }
  0x3a   :  { %934 = vmatpush3.bf16.msra.mxu0 %v933_v5  ;;  %v957_v15 = vpack.c.bf16 %v151_v11, %v150_v10  ;;  %v61_v16 = vld [vmem:[#allocation5 + $0x30] sm:$0xff]  ;;  %v62_v17 = vld [vmem:[#allocation5 + $0x38] sm:$0xff]  ;;  %v960_v18 = vpack.c.bf16 %v153_v13, %v152_v12  ;;  %v154_v19 = vld [vmem:[#allocation5 + $0xa0] sm:$0xff]  ;;  %p1152_p10 = scmp.ne.s32.totalorder %s603_s21, %s1151_s22  ;;  %p1157_p12 = scmp.lt.s32.totalorder %s1151_s22, %s1151_s22 }
  0x3b   :  { %935 = vmatprep.subr.bf16.mxu0 %v1184_v0  ;;  %v155_v20 = vld [vmem:[#allocation5 + $0xa8] sm:$0xff]  ;;  %v942_v21 = vpack.c.bf16 %v62_v17, %v61_v16  ;;  %v63_v22 = vld [vmem:[#allocation5 + $0x40] sm:$0xff]  ;;  %v156_v25 = vld [vmem:[#allocation5 + $0xb0] sm:$0xff] }
  0x3c   :  { %958 = vmatpush3.bf16.msra.mxu1 %v957_v15  ;;  %v64_v23 = vld [vmem:[#allocation5 + $0x48] sm:$0xff]  ;;  %v963_v24 = vpack.c.bf16 %v155_v20, %v154_v19  ;;  %v157_v26 = vld [vmem:[#allocation5 + $0xb8] sm:$0xff]  ;;  %v65_v28 = vld [vmem:[#allocation5 + $0x50] sm:$0xff]  ;;  %p1158_p13 = por %p1157_p12, %p1156_p11 }
  0x3d   :  { %959 = vmatprep.subr.bf16.mxu1 %v1184_v0  ;;  %v945_v27 = vpack.c.bf16 %v64_v23, %v63_v22  ;;  %v66_v29 = vld [vmem:[#allocation5 + $0x58] sm:$0xff]  ;;  %v966_v30 = vpack.c.bf16 %v157_v26, %v156_v25  ;;  %v158_v31 = vld [vmem:[#allocation5 + $0xc0] sm:$0xff]  ;;  %v159_v32 = vld [vmem:[#allocation5 + $0xc8] sm:$0xff] }
  0x3e   :  { %937 = vmatpush3.bf16.msra.mxu0 %v936_v7  ;;  %v948_v33 = vpack.c.bf16 %v66_v29, %v65_v28  ;;  %v67_v34 = vld [vmem:[#allocation5 + $0x60] sm:$0xff]  ;;  %v68_v35 = vld [vmem:[#allocation5 + $0x68] sm:$0xff]  ;;  %v969_v36 = vpack.c.bf16 %v159_v32, %v158_v31  ;;  %v160_v37 = vld [vmem:[#allocation5 + $0xd0] sm:$0xff]  ;;  %p1159_p0 = pnand %p1158_p13, %p1152_p10 }
  0x3f   :  { %938 = vmatprep.subr.bf16.mxu0 %v1184_v0  ;;  %v161_v38 = vld [vmem:[#allocation5 + $0xd8] sm:$0xff]  ;;  %v951_v39 = vpack.c.bf16 %v68_v35, %v67_v34  ;;  %v69_v40 = vld [vmem:[#allocation5 + $0x70] sm:$0xff]  ;;  %v162_v43 = vld [vmem:[#allocation5 + $0xe0] sm:$0xff] }
  0x40   :  { %961 = vmatpush3.bf16.msra.mxu1 %v960_v18  ;;  %v70_v41 = vld [vmem:[#allocation5 + $0x78] sm:$0xff]  ;;  %v972_v42 = vpack.c.bf16 %v161_v38, %v160_v37  ;;  %v163_v44 = vld [vmem:[#allocation5 + $0xe8] sm:$0xff]  ;;  %v54_v47 = vld [vmem:[#allocation2] sm:$0xff] }
  0x41   :  { %962 = vmatprep.subr.bf16.mxu1 %v1184_v0  ;;  %v954_v45 = vpack.c.bf16 %v70_v41, %v69_v40  ;;  %v975_v46 = vpack.c.bf16 %v163_v44, %v162_v43  ;;  %v164_v48 = vld [vmem:[#allocation5 + $0xf0] sm:$0xff]  ;;  %v165_v49 = vld [vmem:[#allocation5 + $0xf8] sm:$0xff]  ;;  %v148_v51 = vld [vmem:[#allocation2 + $0x8] sm:$0xff] }
  0x42   :  { %940 = vmatpush3.bf16.msra.mxu0 %v939_v14  ;;  %v978_v50 = vpack.c.bf16 %v165_v49, %v164_v48  ;;  %v316_v52 = vld [vmem:[#allocation5 + $0x100] sm:$0xff]  ;;  %v317_v53 = vld [vmem:[#allocation5 + $0x108] sm:$0xff]  ;;  %v318_v55 = vld [vmem:[#allocation5 + $0x110] sm:$0xff] }
  0x43   :  { %941 = vmatprep.subr.bf16.mxu0 %v1184_v0  ;;  %v1283_v54 = vpack.c.bf16 %v317_v53, %v316_v52  ;;  %v319_v56 = vld [vmem:[#allocation5 + $0x118] sm:$0xff]  ;;  %v320_v58 = vld [vmem:[#allocation5 + $0x120] sm:$0xff]  ;;  %v321_v59 = vld [vmem:[#allocation5 + $0x128] sm:$0xff] }
  0x44   :  { %964 = vmatpush3.bf16.msra.mxu1 %v963_v24  ;;  %v1289_v57 = vpack.c.bf16 %v319_v56, %v318_v55  ;;  %v1293_v60 = vpack.c.bf16 %v321_v59, %v320_v58  ;;  %v322_v61 = vld [vmem:[#allocation5 + $0x130] sm:$0xff]  ;;  %v323_v62 = vld [vmem:[#allocation5 + $0x138] sm:$0xff]  ;;  %v324_v2 = vld [vmem:[#allocation5 + $0x140] sm:$0xff] }
  0x45   :  { %965 = vmatprep.subr.bf16.mxu1 %v1184_v0  ;;  %v1014_v63 = vpack.c.bf16 %v323_v62, %v322_v61  ;;  %v325_v3 = vld [vmem:[#allocation5 + $0x148] sm:$0xff]  ;;  %v326_v5 = vld [vmem:[#allocation5 + $0x150] sm:$0xff]  ;;  %v327_v6 = vld [vmem:[#allocation5 + $0x158] sm:$0xff] }
  0x46   :  { %943 = vmatpush3.bf16.msra.mxu0 %v942_v21  ;;  %v1017_v4 = vpack.c.bf16 %v325_v3, %v324_v2  ;;  %v1020_v7 = vpack.c.bf16 %v327_v6, %v326_v5  ;;  %v328_v8 = vld [vmem:[#allocation5 + $0x160] sm:$0xff]  ;;  %v329_v9 = vld [vmem:[#allocation5 + $0x168] sm:$0xff]  ;;  %v330_v16 = vld [vmem:[#allocation5 + $0x170] sm:$0xff] }
  0x47   :  { %944 = vmatprep.subr.bf16.mxu0 %v1184_v0  ;;  %v1023_v10 = vpack.c.bf16 %v329_v9, %v328_v8  ;;  %v612_v11 = vld [vmem:[#allocation7] ss:$0 sm:$0xff]  ;;  %v331_v17 = vld [vmem:[#allocation5 + $0x178] sm:$0xff]  ;;  %v613_v19 = vld [vmem:[#allocation7 + $0x1] ss:$0 sm:$0xff] }
  0x48   :  { %967 = vmatpush3.bf16.msra.mxu1 %v966_v30  ;;  %v615_v44 = vld [vmem:[#allocation7 + $0x3] ss:$0 sm:$0xff]  ;;  %v619_v55 = vld [vmem:[#allocation7 + $0x7] ss:$0 sm:$0xff] }
  0x49   :  { %968 = vmatprep.subr.bf16.mxu1 %v1184_v0 }
  0x4a   :  { %946 = vmatpush3.bf16.msra.mxu0 %v945_v27 }
  0x4b   :  { %947 = vmatprep.subr.bf16.mxu0 %v1184_v0 }
  0x4c   :  { %970 = vmatpush3.bf16.msra.mxu1 %v969_v36 }
  0x4d   :  { %971 = vmatprep.subr.bf16.mxu1 %v1184_v0 }
  0x4e   :  { %949 = vmatpush3.bf16.msra.mxu0 %v948_v33 }
  0x4f   :  { %950 = vmatprep.subr.bf16.mxu0 %v1184_v0 }
  0x50   :  { %973 = vmatpush3.bf16.msra.mxu1 %v972_v42 }
  0x51   :  { %974 = vmatprep.subr.bf16.mxu1 %v1184_v0 }
  0x52   :  { %952 = vmatpush3.bf16.msra.mxu0 %v951_v39 }
  0x53   :  { %953 = vmatprep.subr.bf16.mxu0 %v1184_v0 }
  0x54   :  { %976 = vmatpush3.bf16.msra.mxu1 %v975_v46 }
  0x55   :  { %977 = vmatprep.subr.bf16.mxu1 %v1184_v0 }
  0x56   :  { %955 = vmatpush3.bf16.msra.mxu0 %v954_v45  ;;  %v617_v45 = vld [vmem:[#allocation7 + $0x5] ss:$0 sm:$0xff] }
  0x57   :  { %980 = vmatprep.subr.bf16.mxu0 %v1184_v0 }
  0x58   :  { %979 = vmatpush3.bf16.msra.mxu1 %v978_v50 }
  0x59   :  { %755 = vmatmul.mubr.f32.vlgmr.msra.gmra.mrb[0].mxu0 %v54_v47  ;;  %1004 = vmatprep.subr.bf16.mxu1 %v1184_v0 }
  0x5a   :  { %982 = vmatpush3.bf16.msra.mxu0 %v957_v15  ;;  %824 = vmatprep.mubr.msk.f32.mxu0 %vm1185_vm0, %v1186_v1 }
  0x5b   :  { %983 = vmatprep.subr.bf16.mxu0 %v1184_v0 }
  0x5e   :  { %985 = vmatpush3.bf16.msra.mxu0 %v960_v18  ;;  %v1026_v18 = vpack.c.bf16 %v331_v17, %v330_v16 }
  0x5f   :  { %986 = vmatprep.subr.bf16.mxu0 %v1184_v0 }
  0x62   :  { %988 = vmatpush3.bf16.msra.mxu0 %v963_v24 }
  0x63   :  { %989 = vmatprep.subr.bf16.mxu0 %v1184_v0 }
  0x66   :  { %991 = vmatpush3.bf16.msra.mxu0 %v966_v30  ;;  %v614_v30 = vld [vmem:[#allocation7 + $0x2] ss:$0 sm:$0xff] }
  0x67   :  { %992 = vmatprep.subr.bf16.mxu0 %v1184_v0 }
  0x6a   :  { %994 = vmatpush3.bf16.msra.mxu0 %v969_v36 }
  0x6b   :  { %995 = vmatprep.subr.bf16.mxu0 %v1184_v0 }
  0x6e   :  { %997 = vmatpush3.bf16.msra.mxu0 %v972_v42  ;;  %v616_v42 = vld [vmem:[#allocation7 + $0x4] ss:$0 sm:$0xff] }
  0x6f   :  { %998 = vmatprep.subr.bf16.mxu0 %v1184_v0 }
  0x72   :  { %1000 = vmatpush3.bf16.msra.mxu0 %v975_v46 }
  0x73   :  { %1001 = vmatprep.subr.bf16.mxu0 %v1184_v0 }
  0x76   :  { %1003 = vmatpush3.bf16.msra.mxu0 %v978_v50  ;;  %v618_v50 = vld [vmem:[#allocation7 + $0x6] ss:$0 sm:$0xff] }
  0x77   :  { %1028 = vmatprep.subr.bf16.mxu0 %v1184_v0 }
  0x79   :  { %825 = vmatmul.mubr.f32.vlgmr.msra.gmra.mrb[2].mxu0 %v148_v51 }
  0x7a   :  { %894 = vmatprep.mubr.msk.f32.mxu0 %vm1185_vm0, %v1186_v1  ;;  %1030 = vmatpush3.bf16.msra.mxu0 %v1283_v54 }
  0x7b   :  { %1031 = vmatprep.subr.bf16.mxu0 %v1184_v0 }
  0x7e   :  { %1033 = vmatpush3.bf16.msra.mxu0 %v1289_v57 }
  0x7f   :  { %1034 = vmatprep.subr.bf16.mxu0 %v1184_v0 }
  0x82   :  { %1036 = vmatpush3.bf16.msra.mxu0 %v1293_v60 }
  0x83   :  { %1037 = vmatprep.subr.bf16.mxu0 %v1184_v0 }
  0x86   :  { %1039 = vmatpush3.bf16.msra.mxu0 %v1014_v63 }
  0x87   :  { %1040 = vmatprep.subr.bf16.mxu0 %v1184_v0 }
  0x8a   :  { %1042 = vmatpush3.bf16.msra.mxu0 %v1017_v4 }
  0x8b   :  { %1043 = vmatprep.subr.bf16.mxu0 %v1184_v0 }
  0x8e   :  { %1045 = vmatpush3.bf16.msra.mxu0 %v1020_v7 }
  0x8f   :  { %1046 = vmatprep.subr.bf16.mxu0 %v1184_v0 }
  0x92   :  { %1048 = vmatpush3.bf16.msra.mxu0 %v1023_v10 }
  0x93   :  { %1049 = vmatprep.subr.bf16.mxu0 %v1184_v0 }
  0x96   :  { %1051 = vmatpush3.bf16.msra.mxu0 %v1026_v18 }
 0x12c   :  { %v142_v12 = vpop.f32.mrb[0].mxu0 }
 0x12d   :  { %v143_v13 = vadd.f32 %v612_v11, %v142_v12  ;;  %v756_v14 = vpop.f32.mrb[1].mxu0 }
 0x12f   :  { %v146_v15 = vmax.f32 %v143_v13, 0.0 }
 0x131   :  { %790 = vmatmul.mubr.f32.vlgmr.msra.gmra.mrb[0].mxu1 %v146_v15 }
 0x132   :  { %1006 = vmatpush3.bf16.msra.mxu1 %v1283_v54  ;;  %859 = vmatprep.mubr.msk.f32.mxu1 %vm1185_vm0, %v1186_v1 }
 0x133   :  { %1007 = vmatprep.subr.bf16.mxu1 %v1184_v0 }
 0x136   :  { %1009 = vmatpush3.bf16.msra.mxu1 %v1289_v57 }
 0x137   :  { %1010 = vmatprep.subr.bf16.mxu1 %v1184_v0 }
 0x13a   :  { %1012 = vmatpush3.bf16.msra.mxu1 %v1293_v60 }
 0x13b   :  { %1013 = vmatprep.subr.bf16.mxu1 %v1184_v0 }
 0x13e   :  { %1015 = vmatpush3.bf16.msra.mxu1 %v1014_v63 }
 0x13f   :  { %1016 = vmatprep.subr.bf16.mxu1 %v1184_v0 }
 0x142   :  { %1018 = vmatpush3.bf16.msra.mxu1 %v1017_v4 }
 0x143   :  { %1019 = vmatprep.subr.bf16.mxu1 %v1184_v0 }
 0x146   :  { %1021 = vmatpush3.bf16.msra.mxu1 %v1020_v7 }
 0x147   :  { %1022 = vmatprep.subr.bf16.mxu1 %v1184_v0 }
 0x14a   :  { %1024 = vmatpush3.bf16.msra.mxu1 %v1023_v10 }
 0x14b   :  { %1025 = vmatprep.subr.bf16.mxu1 %v1184_v0 }
 0x14c   :  { %v308_v20 = vpop.f32.mrb[2].mxu0 }
 0x14d   :  { %v309_v21 = vadd.f32 %v613_v19, %v308_v20  ;;  %v826_v22 = vpop.f32.mrb[3].mxu0 }
 0x14e   :  { %1027 = vmatpush3.bf16.msra.mxu1 %v1026_v18 }
 0x14f   :  { %1052 = vmatprep.subr.bf16.mxu1 %v1184_v0  ;;  %v312_v23 = vmax.f32 %v309_v21, 0.0 }
 0x151   :  { %895 = vmatmul.mubr.f32.vlgmr.msra.gmra.mrb[4].mxu0 %v312_v23 }
 0x204   :  { %v237_v24 = vpop.f32.mrb[0].mxu1 }
 0x205   :  { %v238_v25 = vadd.f32 %v613_v19, %v237_v24  ;;  %v791_v26 = vpop.f32.mrb[1].mxu1 }
 0x207   :  { %v241_v27 = vmax.f32 %v238_v25, 0.0 }
 0x209   :  { %860 = vmatmul.mubr.f32.vlgmr.msra.gmra.mrb[2].mxu1 %v241_v27 }
 0x20a   :  { %1054 = vmatpush3.bf16.msra.mxu1 %v1283_v54  ;;  %929 = vmatprep.mubr.msk.f32.mxu1 %vm1185_vm0, %v1186_v1  ;;  %v314_v1 = vld [vmem:[#allocation2 + $0x10] sm:$0xff] }
 0x20b   :  { %1055 = vmatprep.subr.bf16.mxu1 %v1184_v0 }
 0x20e   :  { %1057 = vmatpush3.bf16.msra.mxu1 %v1289_v57 }
 0x20f   :  { %1058 = vmatprep.subr.bf16.mxu1 %v1184_v0 }
 0x212   :  { %1060 = vmatpush3.bf16.msra.mxu1 %v1293_v60 }
 0x213   :  { %1061 = vmatprep.subr.bf16.mxu1 %v1184_v0 }
 0x216   :  { %1063 = vmatpush3.bf16.msra.mxu1 %v1014_v63 }
 0x217   :  { %1064 = vmatprep.subr.bf16.mxu1 %v1184_v0 }
 0x21a   :  { %1066 = vmatpush3.bf16.msra.mxu1 %v1017_v4 }
 0x21b   :  { %1067 = vmatprep.subr.bf16.mxu1 %v1184_v0 }
 0x21e   :  { %1069 = vmatpush3.bf16.msra.mxu1 %v1020_v7 }
 0x21f   :  { %1070 = vmatprep.subr.bf16.mxu1 %v1184_v0 }
 0x222   :  { %1072 = vmatpush3.bf16.msra.mxu1 %v1023_v10 }
 0x223   :  { %1073 = vmatprep.subr.bf16.mxu1 %v1184_v0  ;;  %v551_v0 = vld [vmem:[#allocation2 + $0x18] sm:$0xff] }
 0x224   :  { %v474_v28 = vpop.f32.mrb[4].mxu0 }
 0x225   :  { %v896_v29 = vpop.f32.mrb[5].mxu0  ;;  %v475_v33 = vadd.f32 %v614_v30, %v474_v28 }
 0x226   :  { %1075 = vmatpush3.bf16.msra.mxu1 %v1026_v18 }
 0x227   :  { %v478_v36 = vmax.f32 %v475_v33, 0.0 }
 0x229   :  { %930 = vmatmul.mubr.f32.vlgmr.msra.gmra.mrb[4].mxu1 %v314_v1 }
 0x2dc   :  { %v403_v31 = vpop.f32.mrb[2].mxu1 }
 0x2dd   :  { %v861_v32 = vpop.f32.mrb[3].mxu1  ;;  %v404_v34 = vadd.f32 %v614_v30, %v403_v31 }
 0x2df   :  { %v407_v35 = vmax.f32 %v404_v34, 0.0 }
 0x2e1   :  { %552 = vadd.xlane.f32.xlu0 %v407_v35 }
 0x2e5   :  { %561 = vadd.xlane.f32.xlu0 %v478_v36 }
 0x2fc   :  { %v545_v37 = vpop.f32.mrb[4].mxu1 }
 0x2fd   :  { %v931_v38 = vpop.f32.mrb[5].mxu1  ;;  %v546_v39 = vadd.f32 %v614_v30, %v545_v37 }
 0x2ff   :  { %v549_v40 = vmax.f32 %v546_v39, 0.0 }
 0x301   :  { %570 = vadd.xlane.f32.xlu1 %v549_v40 }
 0x305   :  { %579 = vadd.xlane.f32.xlu1 %v551_v0 }
 0x36e   :  { %v553_v41 = vpop.xlane.xlu0 %552 }
 0x36f   :  { %v559_v48 = vmul.f32 %v615_v44, %v553_v41 }
 0x372   :  { %v562_v43 = vpop.xlane.xlu0 %561 }
 0x373   :  { %v568_v46 = vmul.f32 %v616_v42, %v562_v43 }
 0x375   :  { %v569_v51 = vadd.f32 %v568_v46, %v559_v48 }
 0x38e   :  { %v571_v47 = vpop.xlane.xlu1 %570 }
 0x38f   :  { %v577_v49 = vmul.f32 %v617_v45, %v571_v47 }
 0x391   :  { %v578_v53 = vadd.f32 %v577_v49, %v569_v51 }
 0x392   :  { %v580_v52 = vpop.xlane.xlu1 %579 }
 0x393   :  { %v586_v54 = vmul.f32 %v618_v50, %v580_v52 }
 0x395   :  { %v587_v56 = vadd.f32 %v586_v54, %v578_v53 }
 0x397   :  { %v593_v57 = vadd.f32 %v619_v55, %v587_v56 }
 0x399   :  { %v594_v58 = vand.u32 2147483647, %v593_v57 }
 0x39b   :  { %595 = vst [vmem:[#allocation8] sm:$0xff] %v594_v58 }
 0x39c   :  { %1162 = shalt.err (!%p1159_p0)
}
 0x39d   :  { %s1163_s25 = scalar_lea.hbm %s1341_s3, 128 }
 0x39e   :  { %p1164_p1 = scmp.ne.s32.totalorder %s1341_s3, %s1163_s25  ;;  %p1167_p2 = scmp.lt.u32.totalorder %s1163_s25, %s1341_s3 }
 0x3a0   :  { %p1169_p3 = pnand %p1167_p2, %p1164_p1 }
 0x3a2   :  { %1172 = shalt.err (!%p1169_p3)
}
 0x3a3   :  { %605 = dma.vmem_to_hbm [thread:$0]  %s603_s21, 128, %s1341_s3, [#allocation4]  }
 0x3a4   :  { %1177 = dma.done.wait [#allocation4], 128  }
 0x3a5   :  { %1178 = vsyncadd [#allocation4], 4294967168 }
 0x3a6   :  { %609 = vsyncpa [#allocation3], 1 }
 0x3a7   :  { %610 = vsyncpa [#allocation6], 1 }
 0x3a8   :  { %611 = vsyncpa [#allocation4], 1 }

</bundles_post_ra>
